<compile_context>
chip_gen: v6e
topology: v6e:2x2x1
jax: 0.10.0
libtpu: 0.0.40
codegen_flags: <defaults>
</compile_context>

<pallas_src>
import jax
import jax.numpy as jnp
import numpy as np
from jax.experimental import pallas as pl
from jax.experimental.pallas import tpu as pltpu

EPS = 1e-5


def basic_block_kernel(x_ref, wb1_ref, wb2_ref, ws_ref, g_ref, gt_ref,
                       bnp_ref, out_ref):
  """Whole BasicBlock forward (stride=1) in one kernel invocation.

  Layouts (lane-dense folded rows):
    x_ref   : (N, H, W*Cin)                bf16
    wb{1,2} : (3, W*Cin_or_Cout, W*Cout)   bf16 banded per-kh-row weights
    ws_ref  : (W*Cin, W*Cout)              bf16 block-diagonal 1x1 shortcut
    g_ref   : (W*Cout, Cout)               f32 0/1 lane->channel indicator
    gt_ref  : (Cout, W*Cout)               f32 (= g.T)
    bnp_ref : (8, Cout)                    f32 rows = [g1, b1, g2, gs, b2, bs, 0, 0]
    out_ref : (N, H, W*Cout)               f32
  """
  n, h, wci = x_ref.shape
  wco = out_ref.shape[-1]
  c = g_ref.shape[-1]
  m = n * h
  count = float(m * (wco // c))            # N*H*W elements per channel

  g = g_ref[...]
  gt = gt_ref[...]
  bnp = bnp_ref[...]

  # Row-shift keep-masks: kh=0 contributes to output rows r with r % H != 0
  # (top padding) and kh=2 to rows with r % H != H-1 (bottom padding); the
  # same masks also kill the cross-sample / wrap rows introduced by the
  # sublane roll below.
  row_ids = jax.lax.broadcasted_iota(jnp.int32, (m, wco), 0)
  keep_up = (row_ids % h) != 0
  keep_dn = (row_ids % h) != (h - 1)

  def conv3x3(x2d_bf16, wb_ref):
    """3x3 / stride-1 / pad-1 conv: 3 full-M banded MXU matmuls, f32
    accumulation held in vregs, row shifts via sublane roll + mask."""
    mid = jnp.dot(x2d_bf16, wb_ref[1], preferred_element_type=jnp.float32)
    up = jnp.dot(x2d_bf16, wb_ref[0], preferred_element_type=jnp.float32)
    dn = jnp.dot(x2d_bf16, wb_ref[2], preferred_element_type=jnp.float32)
    up = jnp.where(keep_up, pltpu.roll(up, 1, 0), 0.0)      # out row r <- up[r-1]
    dn = jnp.where(keep_dn, pltpu.roll(dn, m - 1, 0), 0.0)  # out row r <- dn[r+1]
    return mid + up + dn                                    # (m, W*Cout) f32

  def bn_affine(pre_list, gamma, beta):
    """Training-mode batch-stat BN of several pre-activations as per-lane
    affines.  pre_list: k arrays (m, W*C) f32 (each normalized independently);
    gamma/beta: (k, C).  Returns (scale, shift), each (k, W*C), with
    BN_i(y) == y * scale[i] + shift[i].  The lane->channel reduce and the
    channel->lane broadcast are each one batched MXU matmul."""
    k = len(pre_list)
    sums = [jnp.sum(p, axis=0, keepdims=True) for p in pre_list]
    sqs = [jnp.sum(p * p, axis=0, keepdims=True) for p in pre_list]
    stats = jnp.concatenate(sums + sqs, axis=0)                      # (2k, W*C)
    red = jnp.dot(stats, g, preferred_element_type=jnp.float32)      # (2k, C)
    mean = red[:k] / count
    var = red[k:] / count - mean * mean                              # biased var
    scale_c = gamma * jax.lax.rsqrt(var + EPS)                       # (k, C)
    shift_c = beta - mean * scale_c
    aff = jnp.dot(jnp.concatenate([scale_c, shift_c], axis=0), gt,
                  preferred_element_type=jnp.float32)                # (2k, W*C)
    return aff[:k], aff[k:]

  # Hoisted bf16 2-D conv operand (already bf16; reshape keeps the lane dim).
  x2d = x_ref[...].reshape(m, wci)

  # conv1 (3x3, pad 1, no bias) -> bn1 -> relu
  y1p = conv3x3(x2d, wb1_ref)
  sc1, sh1 = bn_affine([y1p], bnp[0:1], bnp[1:2])
  y1 = jnp.maximum(y1p * sc1 + sh1, 0.0)

  # conv2 (3x3) and projection shortcut (1x1); BN stats batched for both.
  y2p = conv3x3(y1.astype(jnp.bfloat16), wb2_ref)
  sp = jnp.dot(x2d, ws_ref[...], preferred_element_type=jnp.float32)
  sc, sh = bn_affine([y2p, sp], bnp[2:4], bnp[4:6])

  # Fused epilogue: bn2(conv2) + bn_sc(shortcut) -> relu; lane-dense store.
  out = jnp.maximum(y2p * sc[0:1] + sh[0:1] + sp * sc[1:2] + sh[1:2], 0.0)
  out_ref[...] = out.reshape(n, h, wco).astype(out_ref.dtype)


def _banded_conv3x3_weights(w_oihw, width):
  """OIHW 3x3 weight -> (3, W*Cin, W*Cout) bf16 banded matrices (one per kh).

  Band[kh][wi*Cin+ci, wo*Cout+co] = w[co, ci, kh, wi-wo+1] when the kw tap
  wi-wo+1 is in {0,1,2}, else 0 (folds the stride-1/pad-1 left-right padding
  into the matmul)."""
  cout, cin = w_oihw.shape[0], w_oihw.shape[1]
  w_hwio = jnp.transpose(w_oihw, (2, 3, 1, 0))               # (3, 3, Cin, Cout)
  wi = np.arange(width)[:, None]
  wo = np.arange(width)[None, :]
  kw = wi - wo + 1                                           # (W, W)
  valid = ((kw >= 0) & (kw <= 2)).astype(np.float32)
  band = w_hwio[:, np.clip(kw, 0, 2), :, :]                  # (3, W, W, Cin, Cout)
  band = band * valid[None, :, :, None, None]
  band = jnp.transpose(band, (0, 1, 3, 2, 4))                # (3, W, Cin, W, Cout)
  return band.reshape(3, width * cin, width * cout).astype(jnp.bfloat16)


def _blockdiag_conv1x1_weight(ws_oihw, width):
  """1x1 OIHW weight -> (W*Cin, W*Cout) bf16 block-diagonal folded matrix."""
  ws2d = ws_oihw[:, :, 0, 0].T                               # (Cin, Cout)
  return jnp.kron(jnp.eye(width, dtype=ws2d.dtype), ws2d).astype(jnp.bfloat16)


@jax.jit
def basic_block(x_nchw, w1, g1, b1, w2, g2, b2, ws, gs, bs):
  """BasicBlock forward. NCHW in/out (PyTorch convention)."""
  n, cin, h, w = x_nchw.shape
  cout = w1.shape[0]
  wci, wco = w * cin, w * cout

  # NCHW -> lane-dense folded rows (N, H, W*Cin), bf16 at the kernel boundary.
  x_rows = jnp.transpose(x_nchw, (0, 2, 3, 1)).reshape(n, h, wci)
  x_rows = x_rows.astype(jnp.bfloat16)

  wb1 = _banded_conv3x3_weights(w1, w)        # (3, W*Cin,  W*Cout) bf16
  wb2 = _banded_conv3x3_weights(w2, w)        # (3, W*Cout, W*Cout) bf16
  wsf = _blockdiag_conv1x1_weight(ws, w)      # (W*Cin, W*Cout)     bf16

  # 0/1 indicator: lane (w*Cout + c) -> channel c, and its transpose.
  g_np = np.tile(np.eye(cout, dtype=np.float32), (w, 1))     # (W*Cout, Cout)
  g_mat = jnp.asarray(g_np)
  gt_mat = jnp.asarray(g_np.T)

  # All six BN affine params packed in one small array (one VMEM tile / DMA).
  zero = jnp.zeros((cout,), jnp.float32)
  bn_params = jnp.stack([g1, b1, g2, gs, b2, bs, zero, zero],
                        axis=0).astype(jnp.float32)          # (8, Cout)

  out_rows = pl.pallas_call(
      basic_block_kernel,
      out_shape=jax.ShapeDtypeStruct((n, h, wco), jnp.float32),
      in_specs=[pl.BlockSpec(memory_space=pltpu.MemorySpace.VMEM)] * 7,
      out_specs=pl.BlockSpec(memory_space=pltpu.MemorySpace.VMEM),
  )(x_rows, wb1, wb2, wsf, g_mat, gt_mat, bn_params)

  out = out_rows.reshape(n, h, w, cout)
  return jnp.transpose(out, (0, 3, 1, 2))                    # -> NCHW


def reference(x, w1, g1, b1, w2, g2, b2, ws, gs, bs):
  """Pure-JAX f32 reference of the PyTorch forward (training-mode BN)."""
  def conv(x, w, pad):
    return jax.lax.conv_general_dilated(
        x, w, window_strides=(1, 1), padding=[(pad, pad), (pad, pad)],
        dimension_numbers=('NCHW', 'OIHW', 'NCHW'))

  def bn(y, g, b):
    mean = jnp.mean(y, axis=(0, 2, 3), keepdims=True)
    var = jnp.mean(jnp.square(y - mean), axis=(0, 2, 3), keepdims=True)
    return ((y - mean) * jax.lax.rsqrt(var + EPS) * g.reshape(1, -1, 1, 1)
            + b.reshape(1, -1, 1, 1))

  out = jax.nn.relu(bn(conv(x, w1, 1), g1, b1))
  out = bn(conv(out, w2, 1), g2, b2)
  sc = bn(conv(x, ws, 0), gs, bs)
  return jax.nn.relu(out + sc)


if __name__ == "__main__":
  key = jax.random.PRNGKey(0)
  N, in_planes, H, W = 2, 4, 16, 16
  planes = 8  # in_planes != planes -> projection shortcut (1x1 conv + BN)

  k = jax.random.split(key, 4)
  x = jax.random.normal(k[0], (N, in_planes, H, W), jnp.float32)

  # Deterministic synthetic parameters (shapes from the module's __init__).
  w1 = jax.random.normal(k[1], (planes, in_planes, 3, 3), jnp.float32)
  w1 = w1 / np.sqrt(in_planes * 9)
  w2 = jax.random.normal(k[2], (planes, planes, 3, 3), jnp.float32)
  w2 = w2 / np.sqrt(planes * 9)
  ws = jax.random.normal(k[3], (planes, in_planes, 1, 1), jnp.float32)
  ws = ws / np.sqrt(in_planes)

  # BatchNorm2d default affine init: gamma = 1, beta = 0.
  g1 = jnp.ones((planes,), jnp.float32); b1 = jnp.zeros((planes,), jnp.float32)
  g2 = jnp.ones((planes,), jnp.float32); b2 = jnp.zeros((planes,), jnp.float32)
  gs = jnp.ones((planes,), jnp.float32); bs = jnp.zeros((planes,), jnp.float32)

  out = basic_block(x, w1, g1, b1, w2, g2, b2, ws, gs, bs)
  out = jax.block_until_ready(out)

  ref = reference(x, w1, g1, b1, w2, g2, b2, ws, gs, bs)
  # bf16 MXU operands vs f32 reference: ~1e-2-level error is expected.
  np.testing.assert_allclose(np.asarray(out), np.asarray(ref),
                             rtol=5e-2, atol=5e-2)

  print("KERNEL_OK")
</pallas_src>

<mosaic_0001>
module attributes {stable_mosaic.version = 11 : i64} {
  func.func @basic_block_kernel(%arg0: memref<2x16x64xbf16, #tpu.memory_space<vmem>>, %arg1: memref<3x64x128xbf16, #tpu.memory_space<vmem>>, %arg2: memref<3x128x128xbf16, #tpu.memory_space<vmem>>, %arg3: memref<64x128xbf16, #tpu.memory_space<vmem>>, %arg4: memref<128x8xf32, #tpu.memory_space<vmem>>, %arg5: memref<8x128xf32, #tpu.memory_space<vmem>>, %arg6: memref<8x8xf32, #tpu.memory_space<vmem>>, %arg7: memref<2x16x128xf32, #tpu.memory_space<vmem>>) attributes {dimension_semantics = [], scalar_prefetch = 0 : i64, scratch_operands = 0 : i64, tpu.core_type = #tpu.core_type<tc>} {
    %c0 = arith.constant 0 : index
    %c0_0 = arith.constant 0 : index
    %0 = vector.load %arg4[%c0, %c0_0] : memref<128x8xf32, #tpu.memory_space<vmem>>, vector<128x8xf32>
    %c0_1 = arith.constant 0 : index
    %c0_2 = arith.constant 0 : index
    %1 = vector.load %arg5[%c0_1, %c0_2] : memref<8x128xf32, #tpu.memory_space<vmem>>, vector<8x128xf32>
    %c0_3 = arith.constant 0 : index
    %c0_4 = arith.constant 0 : index
    %2 = vector.load %arg6[%c0_3, %c0_4] : memref<8x8xf32, #tpu.memory_space<vmem>>, vector<8x8xf32>
    %3 = tpu.iota {dimensions = array<i32: 0>} : vector<32x128xi32>
    %c16_i32 = arith.constant 16 : i32
    %c0_i32 = arith.constant 0 : i32
    %4 = arith.cmpi eq, %c16_i32, %c0_i32 : i32
    %c1_i32 = arith.constant 1 : i32
    %5 = arith.select %4, %c1_i32, %c16_i32 : i32
    %6 = vector.broadcast %5 : i32 to vector<32x128xi32>
    %7 = arith.remsi %3, %6 : vector<32x128xi32>
    %c0_i32_5 = arith.constant 0 : i32
    %8 = vector.broadcast %c0_i32_5 : i32 to vector<32x128xi32>
    %9 = arith.cmpi ne, %7, %8 : vector<32x128xi32>
    %c0_i32_6 = arith.constant 0 : i32
    %10 = vector.broadcast %c0_i32_6 : i32 to vector<32x128xi32>
    %11 = arith.cmpi slt, %7, %10 : vector<32x128xi32>
    %c0_i32_7 = arith.constant 0 : i32
    %12 = arith.cmpi slt, %5, %c0_i32_7 : i32
    %13 = vector.broadcast %12 : i1 to vector<32x128xi1>
    %14 = vector.broadcast %13 : vector<32x128xi1> to vector<32x128xi1>
    %15 = arith.xori %11, %14 : vector<32x128xi1>
    %16 = arith.andi %15, %9 : vector<32x128xi1>
    %17 = vector.broadcast %5 : i32 to vector<32x128xi32>
    %18 = arith.addi %7, %17 : vector<32x128xi32>
    %19 = arith.select %16, %18, %7 : vector<32x128xi1>, vector<32x128xi32>
    %c0_i32_8 = arith.constant 0 : i32
    %20 = vector.broadcast %c0_i32_8 : i32 to vector<32x128xi32>
    %21 = arith.cmpi ne, %19, %20 : vector<32x128xi32>
    %c16_i32_9 = arith.constant 16 : i32
    %c0_i32_10 = arith.constant 0 : i32
    %22 = arith.cmpi eq, %c16_i32_9, %c0_i32_10 : i32
    %c1_i32_11 = arith.constant 1 : i32
    %23 = arith.select %22, %c1_i32_11, %c16_i32_9 : i32
    %24 = vector.broadcast %23 : i32 to vector<32x128xi32>
    %25 = arith.remsi %3, %24 : vector<32x128xi32>
    %c0_i32_12 = arith.constant 0 : i32
    %26 = vector.broadcast %c0_i32_12 : i32 to vector<32x128xi32>
    %27 = arith.cmpi ne, %25, %26 : vector<32x128xi32>
    %c0_i32_13 = arith.constant 0 : i32
    %28 = vector.broadcast %c0_i32_13 : i32 to vector<32x128xi32>
    %29 = arith.cmpi slt, %25, %28 : vector<32x128xi32>
    %c0_i32_14 = arith.constant 0 : i32
    %30 = arith.cmpi slt, %23, %c0_i32_14 : i32
    %31 = vector.broadcast %30 : i1 to vector<32x128xi1>
    %32 = vector.broadcast %31 : vector<32x128xi1> to vector<32x128xi1>
    %33 = arith.xori %29, %32 : vector<32x128xi1>
    %34 = arith.andi %33, %27 : vector<32x128xi1>
    %35 = vector.broadcast %23 : i32 to vector<32x128xi32>
    %36 = arith.addi %25, %35 : vector<32x128xi32>
    %37 = arith.select %34, %36, %25 : vector<32x128xi1>, vector<32x128xi32>
    %c15_i32 = arith.constant 15 : i32
    %38 = vector.broadcast %c15_i32 : i32 to vector<32x128xi32>
    %39 = arith.cmpi ne, %37, %38 : vector<32x128xi32>
    %c0_15 = arith.constant 0 : index
    %c0_16 = arith.constant 0 : index
    %c0_17 = arith.constant 0 : index
    %40 = vector.load %arg0[%c0_15, %c0_16, %c0_17] : memref<2x16x64xbf16, #tpu.memory_space<vmem>>, vector<2x16x64xbf16>
    %41 = vector.shape_cast %40 : vector<2x16x64xbf16> to vector<32x64xbf16>
    %c1 = arith.constant 1 : index
    %c0_18 = arith.constant 0 : index
    %c0_19 = arith.constant 0 : index
    %42 = vector.load %arg1[%c1, %c0_18, %c0_19] : memref<3x64x128xbf16, #tpu.memory_space<vmem>>, vector<1x64x128xbf16>
    %43 = vector.shape_cast %42 : vector<1x64x128xbf16> to vector<64x128xbf16>
    %cst = arith.constant dense<0.000000e+00> : vector<32x128xf32>
    %44 = tpu.matmul %41, %43, %cst {dimension_numbers = #tpu.dot_dimension_numbers<[1], [0], [0], [1], [0, 0, 1, 1], [], []>} : vector<32x64xbf16>, vector<64x128xbf16>, vector<32x128xf32> -> vector<32x128xf32>
    %c0_20 = arith.constant 0 : index
    %c0_21 = arith.constant 0 : index
    %c0_22 = arith.constant 0 : index
    %45 = vector.load %arg1[%c0_20, %c0_21, %c0_22] : memref<3x64x128xbf16, #tpu.memory_space<vmem>>, vector<1x64x128xbf16>
    %46 = vector.shape_cast %45 : vector<1x64x128xbf16> to vector<64x128xbf16>
    %cst_23 = arith.constant dense<0.000000e+00> : vector<32x128xf32>
    %47 = tpu.matmul %41, %46, %cst_23 {dimension_numbers = #tpu.dot_dimension_numbers<[1], [0], [0], [1], [0, 0, 1, 1], [], []>} : vector<32x64xbf16>, vector<64x128xbf16>, vector<32x128xf32> -> vector<32x128xf32>
    %c2 = arith.constant 2 : index
    %c0_24 = arith.constant 0 : index
    %c0_25 = arith.constant 0 : index
    %48 = vector.load %arg1[%c2, %c0_24, %c0_25] : memref<3x64x128xbf16, #tpu.memory_space<vmem>>, vector<1x64x128xbf16>
    %49 = vector.shape_cast %48 : vector<1x64x128xbf16> to vector<64x128xbf16>
    %cst_26 = arith.constant dense<0.000000e+00> : vector<32x128xf32>
    %50 = tpu.matmul %41, %49, %cst_26 {dimension_numbers = #tpu.dot_dimension_numbers<[1], [0], [0], [1], [0, 0, 1, 1], [], []>} : vector<32x64xbf16>, vector<64x128xbf16>, vector<32x128xf32> -> vector<32x128xf32>
    %c1_i32_27 = arith.constant 1 : i32
    %51 = tpu.dynamic_rotate %47 by %c1_i32_27 dim 0 : vector<32x128xf32>, i32 -> vector<32x128xf32>
    %cst_28 = arith.constant 0.000000e+00 : f32
    %52 = vector.broadcast %cst_28 : f32 to vector<32x128xf32>
    %53 = arith.select %21, %51, %52 : vector<32x128xi1>, vector<32x128xf32>
    %c31_i32 = arith.constant 31 : i32
    %54 = tpu.dynamic_rotate %50 by %c31_i32 dim 0 : vector<32x128xf32>, i32 -> vector<32x128xf32>
    %cst_29 = arith.constant 0.000000e+00 : f32
    %55 = vector.broadcast %cst_29 : f32 to vector<32x128xf32>
    %56 = arith.select %39, %54, %55 : vector<32x128xi1>, vector<32x128xf32>
    %57 = arith.addf %44, %53 : vector<32x128xf32>
    %58 = arith.addf %57, %56 : vector<32x128xf32>
    %59 = vector.extract_strided_slice %2 {offsets = [0, 0], sizes = [1, 8], strides = [1, 1]} : vector<8x8xf32> to vector<1x8xf32>
    %60 = vector.extract_strided_slice %2 {offsets = [1, 0], sizes = [1, 8], strides = [1, 1]} : vector<8x8xf32> to vector<1x8xf32>
    %cst_30 = arith.constant dense<0.000000e+00> : vector<128xf32>
    %61 = vector.multi_reduction <add>, %58, %cst_30 [0] : vector<32x128xf32> to vector<128xf32>
    %62 = vector.shape_cast %61 : vector<128xf32> to vector<1x128xf32>
    %63 = arith.mulf %58, %58 : vector<32x128xf32>
    %cst_31 = arith.constant dense<0.000000e+00> : vector<128xf32>
    %64 = vector.multi_reduction <add>, %63, %cst_31 [0] : vector<32x128xf32> to vector<128xf32>
    %65 = vector.shape_cast %64 : vector<128xf32> to vector<1x128xf32>
    %66 = tpu.concatenate %62, %65 in 0 : vector<1x128xf32>, vector<1x128xf32> -> vector<2x128xf32>
    %cst_32 = arith.constant dense<0.000000e+00> : vector<2x8xf32>
    %67 = tpu.matmul %66, %0, %cst_32 {dimension_numbers = #tpu.dot_dimension_numbers<[1], [0], [0], [1], [0, 0, 1, 1], [], []>} : vector<2x128xf32>, vector<128x8xf32>, vector<2x8xf32> -> vector<2x8xf32>
    %68 = vector.extract_strided_slice %67 {offsets = [0, 0], sizes = [1, 8], strides = [1, 1]} : vector<2x8xf32> to vector<1x8xf32>
    %cst_33 = arith.constant 5.120000e+02 : f32
    %69 = vector.broadcast %cst_33 : f32 to vector<1x8xf32>
    %70 = arith.divf %68, %69 : vector<1x8xf32>
    %71 = vector.extract_strided_slice %67 {offsets = [1, 0], sizes = [1, 8], strides = [1, 1]} : vector<2x8xf32> to vector<1x8xf32>
    %cst_34 = arith.constant 5.120000e+02 : f32
    %72 = vector.broadcast %cst_34 : f32 to vector<1x8xf32>
    %73 = arith.divf %71, %72 : vector<1x8xf32>
    %74 = arith.mulf %70, %70 : vector<1x8xf32>
    %75 = arith.subf %73, %74 : vector<1x8xf32>
    %cst_35 = arith.constant 9.99999974E-6 : f32
    %76 = vector.broadcast %cst_35 : f32 to vector<1x8xf32>
    %77 = arith.addf %75, %76 : vector<1x8xf32>
    %78 = math.rsqrt %77 : vector<1x8xf32>
    %79 = arith.mulf %59, %78 : vector<1x8xf32>
    %80 = arith.mulf %70, %79 : vector<1x8xf32>
    %81 = arith.subf %60, %80 : vector<1x8xf32>
    %82 = tpu.concatenate %79, %81 in 0 : vector<1x8xf32>, vector<1x8xf32> -> vector<2x8xf32>
    %cst_36 = arith.constant dense<0.000000e+00> : vector<2x128xf32>
    %83 = tpu.matmul %82, %1, %cst_36 {dimension_numbers = #tpu.dot_dimension_numbers<[1], [0], [0], [1], [0, 0, 1, 1], [], []>} : vector<2x8xf32>, vector<8x128xf32>, vector<2x128xf32> -> vector<2x128xf32>
    %84 = vector.extract_strided_slice %83 {offsets = [0, 0], sizes = [1, 128], strides = [1, 1]} : vector<2x128xf32> to vector<1x128xf32>
    %85 = vector.extract_strided_slice %83 {offsets = [1, 0], sizes = [1, 128], strides = [1, 1]} : vector<2x128xf32> to vector<1x128xf32>
    %86 = vector.broadcast %84 : vector<1x128xf32> to vector<32x128xf32>
    %87 = arith.mulf %58, %86 : vector<32x128xf32>
    %88 = vector.broadcast %85 : vector<1x128xf32> to vector<32x128xf32>
    %89 = arith.addf %87, %88 : vector<32x128xf32>
    %cst_37 = arith.constant 0.000000e+00 : f32
    %90 = vector.broadcast %cst_37 : f32 to vector<32x128xf32>
    %91 = arith.maximumf %89, %90 : vector<32x128xf32>
    %92 = arith.truncf %91 : vector<32x128xf32> to vector<32x128xbf16>
    %c1_38 = arith.constant 1 : index
    %c0_39 = arith.constant 0 : index
    %c0_40 = arith.constant 0 : index
    %93 = vector.load %arg2[%c1_38, %c0_39, %c0_40] : memref<3x128x128xbf16, #tpu.memory_space<vmem>>, vector<1x128x128xbf16>
    %94 = vector.shape_cast %93 : vector<1x128x128xbf16> to vector<128x128xbf16>
    %cst_41 = arith.constant dense<0.000000e+00> : vector<32x128xf32>
    %95 = tpu.matmul %92, %94, %cst_41 {dimension_numbers = #tpu.dot_dimension_numbers<[1], [0], [0], [1], [0, 0, 1, 1], [], []>} : vector<32x128xbf16>, vector<128x128xbf16>, vector<32x128xf32> -> vector<32x128xf32>
    %c0_42 = arith.constant 0 : index
    %c0_43 = arith.constant 0 : index
    %c0_44 = arith.constant 0 : index
    %96 = vector.load %arg2[%c0_42, %c0_43, %c0_44] : memref<3x128x128xbf16, #tpu.memory_space<vmem>>, vector<1x128x128xbf16>
    %97 = vector.shape_cast %96 : vector<1x128x128xbf16> to vector<128x128xbf16>
    %cst_45 = arith.constant dense<0.000000e+00> : vector<32x128xf32>
    %98 = tpu.matmul %92, %97, %cst_45 {dimension_numbers = #tpu.dot_dimension_numbers<[1], [0], [0], [1], [0, 0, 1, 1], [], []>} : vector<32x128xbf16>, vector<128x128xbf16>, vector<32x128xf32> -> vector<32x128xf32>
    %c2_46 = arith.constant 2 : index
    %c0_47 = arith.constant 0 : index
    %c0_48 = arith.constant 0 : index
    %99 = vector.load %arg2[%c2_46, %c0_47, %c0_48] : memref<3x128x128xbf16, #tpu.memory_space<vmem>>, vector<1x128x128xbf16>
    %100 = vector.shape_cast %99 : vector<1x128x128xbf16> to vector<128x128xbf16>
    %cst_49 = arith.constant dense<0.000000e+00> : vector<32x128xf32>
    %101 = tpu.matmul %92, %100, %cst_49 {dimension_numbers = #tpu.dot_dimension_numbers<[1], [0], [0], [1], [0, 0, 1, 1], [], []>} : vector<32x128xbf16>, vector<128x128xbf16>, vector<32x128xf32> -> vector<32x128xf32>
    %c1_i32_50 = arith.constant 1 : i32
    %102 = tpu.dynamic_rotate %98 by %c1_i32_50 dim 0 : vector<32x128xf32>, i32 -> vector<32x128xf32>
    %cst_51 = arith.constant 0.000000e+00 : f32
    %103 = vector.broadcast %cst_51 : f32 to vector<32x128xf32>
    %104 = arith.select %21, %102, %103 : vector<32x128xi1>, vector<32x128xf32>
    %c31_i32_52 = arith.constant 31 : i32
    %105 = tpu.dynamic_rotate %101 by %c31_i32_52 dim 0 : vector<32x128xf32>, i32 -> vector<32x128xf32>
    %cst_53 = arith.constant 0.000000e+00 : f32
    %106 = vector.broadcast %cst_53 : f32 to vector<32x128xf32>
    %107 = arith.select %39, %105, %106 : vector<32x128xi1>, vector<32x128xf32>
    %108 = arith.addf %95, %104 : vector<32x128xf32>
    %109 = arith.addf %108, %107 : vector<32x128xf32>
    %c0_54 = arith.constant 0 : index
    %c0_55 = arith.constant 0 : index
    %110 = vector.load %arg3[%c0_54, %c0_55] : memref<64x128xbf16, #tpu.memory_space<vmem>>, vector<64x128xbf16>
    %cst_56 = arith.constant dense<0.000000e+00> : vector<32x128xf32>
    %111 = tpu.matmul %41, %110, %cst_56 {dimension_numbers = #tpu.dot_dimension_numbers<[1], [0], [0], [1], [0, 0, 1, 1], [], []>} : vector<32x64xbf16>, vector<64x128xbf16>, vector<32x128xf32> -> vector<32x128xf32>
    %112 = vector.extract_strided_slice %2 {offsets = [2, 0], sizes = [2, 8], strides = [1, 1]} : vector<8x8xf32> to vector<2x8xf32>
    %113 = vector.extract_strided_slice %2 {offsets = [4, 0], sizes = [2, 8], strides = [1, 1]} : vector<8x8xf32> to vector<2x8xf32>
    %cst_57 = arith.constant dense<0.000000e+00> : vector<128xf32>
    %114 = vector.multi_reduction <add>, %109, %cst_57 [0] : vector<32x128xf32> to vector<128xf32>
    %115 = vector.shape_cast %114 : vector<128xf32> to vector<1x128xf32>
    %cst_58 = arith.constant dense<0.000000e+00> : vector<128xf32>
    %116 = vector.multi_reduction <add>, %111, %cst_58 [0] : vector<32x128xf32> to vector<128xf32>
    %117 = vector.shape_cast %116 : vector<128xf32> to vector<1x128xf32>
    %118 = arith.mulf %109, %109 : vector<32x128xf32>
    %cst_59 = arith.constant dense<0.000000e+00> : vector<128xf32>
    %119 = vector.multi_reduction <add>, %118, %cst_59 [0] : vector<32x128xf32> to vector<128xf32>
    %120 = vector.shape_cast %119 : vector<128xf32> to vector<1x128xf32>
    %121 = arith.mulf %111, %111 : vector<32x128xf32>
    %cst_60 = arith.constant dense<0.000000e+00> : vector<128xf32>
    %122 = vector.multi_reduction <add>, %121, %cst_60 [0] : vector<32x128xf32> to vector<128xf32>
    %123 = vector.shape_cast %122 : vector<128xf32> to vector<1x128xf32>
    %124 = tpu.concatenate %115, %117, %120, %123 in 0 : vector<1x128xf32>, vector<1x128xf32>, vector<1x128xf32>, vector<1x128xf32> -> vector<4x128xf32>
    %cst_61 = arith.constant dense<0.000000e+00> : vector<4x8xf32>
    %125 = tpu.matmul %124, %0, %cst_61 {dimension_numbers = #tpu.dot_dimension_numbers<[1], [0], [0], [1], [0, 0, 1, 1], [], []>} : vector<4x128xf32>, vector<128x8xf32>, vector<4x8xf32> -> vector<4x8xf32>
    %126 = vector.extract_strided_slice %125 {offsets = [0, 0], sizes = [2, 8], strides = [1, 1]} : vector<4x8xf32> to vector<2x8xf32>
    %cst_62 = arith.constant 5.120000e+02 : f32
    %127 = vector.broadcast %cst_62 : f32 to vector<2x8xf32>
    %128 = arith.divf %126, %127 : vector<2x8xf32>
    %129 = vector.extract_strided_slice %125 {offsets = [2, 0], sizes = [2, 8], strides = [1, 1]} : vector<4x8xf32> to vector<2x8xf32>
    %cst_63 = arith.constant 5.120000e+02 : f32
    %130 = vector.broadcast %cst_63 : f32 to vector<2x8xf32>
    %131 = arith.divf %129, %130 : vector<2x8xf32>
    %132 = arith.mulf %128, %128 : vector<2x8xf32>
    %133 = arith.subf %131, %132 : vector<2x8xf32>
    %cst_64 = arith.constant 9.99999974E-6 : f32
    %134 = vector.broadcast %cst_64 : f32 to vector<2x8xf32>
    %135 = arith.addf %133, %134 : vector<2x8xf32>
    %136 = math.rsqrt %135 : vector<2x8xf32>
    %137 = arith.mulf %112, %136 : vector<2x8xf32>
    %138 = arith.mulf %128, %137 : vector<2x8xf32>
    %139 = arith.subf %113, %138 : vector<2x8xf32>
    %140 = tpu.concatenate %137, %139 in 0 : vector<2x8xf32>, vector<2x8xf32> -> vector<4x8xf32>
    %cst_65 = arith.constant dense<0.000000e+00> : vector<4x128xf32>
    %141 = tpu.matmul %140, %1, %cst_65 {dimension_numbers = #tpu.dot_dimension_numbers<[1], [0], [0], [1], [0, 0, 1, 1], [], []>} : vector<4x8xf32>, vector<8x128xf32>, vector<4x128xf32> -> vector<4x128xf32>
    %142 = vector.extract_strided_slice %141 {offsets = [0, 0], sizes = [2, 128], strides = [1, 1]} : vector<4x128xf32> to vector<2x128xf32>
    %143 = vector.extract_strided_slice %141 {offsets = [2, 0], sizes = [2, 128], strides = [1, 1]} : vector<4x128xf32> to vector<2x128xf32>
    %144 = vector.extract_strided_slice %142 {offsets = [0, 0], sizes = [1, 128], strides = [1, 1]} : vector<2x128xf32> to vector<1x128xf32>
    %145 = vector.broadcast %144 : vector<1x128xf32> to vector<32x128xf32>
    %146 = arith.mulf %109, %145 : vector<32x128xf32>
    %147 = vector.extract_strided_slice %143 {offsets = [0, 0], sizes = [1, 128], strides = [1, 1]} : vector<2x128xf32> to vector<1x128xf32>
    %148 = vector.broadcast %147 : vector<1x128xf32> to vector<32x128xf32>
    %149 = arith.addf %146, %148 : vector<32x128xf32>
    %150 = vector.extract_strided_slice %142 {offsets = [1, 0], sizes = [1, 128], strides = [1, 1]} : vector<2x128xf32> to vector<1x128xf32>
    %151 = vector.broadcast %150 : vector<1x128xf32> to vector<32x128xf32>
    %152 = arith.mulf %111, %151 : vector<32x128xf32>
    %153 = arith.addf %149, %152 : vector<32x128xf32>
    %154 = vector.extract_strided_slice %143 {offsets = [1, 0], sizes = [1, 128], strides = [1, 1]} : vector<2x128xf32> to vector<1x128xf32>
    %155 = vector.broadcast %154 : vector<1x128xf32> to vector<32x128xf32>
    %156 = arith.addf %153, %155 : vector<32x128xf32>
    %cst_66 = arith.constant 0.000000e+00 : f32
    %157 = vector.broadcast %cst_66 : f32 to vector<32x128xf32>
    %158 = arith.maximumf %156, %157 : vector<32x128xf32>
    %159 = vector.shape_cast %158 : vector<32x128xf32> to vector<2x16x128xf32>
    %c0_67 = arith.constant 0 : index
    %c0_68 = arith.constant 0 : index
    %c0_69 = arith.constant 0 : index
    %160 = vector.load %arg7[%c0_67, %c0_68, %c0_69] : memref<2x16x128xf32, #tpu.memory_space<vmem>>, vector<2x16x128xf32>
    tpu.vector_store %arg7[%c0_67, %c0_68, %c0_69], %159 {strides = array<i32>} : memref<2x16x128xf32, #tpu.memory_space<vmem>>, vector<2x16x128xf32>,
    return
  }
}

</mosaic_0001>

<bundles_post_ra>
// kernel: basic_block.1
= control target key start
LH: loop header
LB: loop body
LE: loop exit
PB: predicated region body
PF: predicated region fallthrough
CT: control target
= control target key end

     0   :  { %vm161_vm0 = vcmask 523264   ;;  %v1750_v14 = vmov 0.0   ;;  %vm1751_vm1 = vmmov 0   ;;  %v45_v32 = vlaneseq  ;;  %s2283_s1 = inlined_call_operand.vmem [shape: bf16[3,64,128], index: 1, kind: input, shape index: {}]   ;;  %s2284_s0 = inlined_call_operand.vmem [shape: bf16[2,16,64], index: 0, kind: input, shape index: {}]   ;;  %s2285_s4 = inlined_call_operand.vmem [shape: f32[128,8], index: 4, kind: input, shape index: {}]   ;;  %s2286_s5 = inlined_call_operand.vmem [shape: f32[8,128], index: 5, kind: input, shape index: {}]   ;;  %s2287_s2 = inlined_call_operand.vmem [shape: bf16[3,128,128], index: 2, kind: input, shape index: {}]   ;;  %s2288_s6 = inlined_call_operand.vmem [shape: f32[8,8], index: 6, kind: input, shape index: {}]   ;;  %s2289_s3 = inlined_call_operand.vmem [shape: bf16[64,128], index: 3, kind: input, shape index: {}]   ;;  %s2290_s7 = inlined_call_operand.vmem [shape: f32[2,16,128], index: 7, kind: output, shape index: {}]  }
   0x1   :  { %v1704_v0 = vld [vmem:[%s2283_s1 + $0x18] sm:$0xff]   ;;  %v1705_v1 = vld [vmem:[%s2283_s1 + $0x10] sm:$0xff]   ;;  %v1706_v3 = vld [vmem:[%s2283_s1 + $0x8] sm:$0xff]   ;;  %vm424_vm8 = vcmask 1040384   ;;  %vm515_vm9 = vcmask 64512   ;;  %vm1106_vm10 = vcmask 1041408  }
   0x2   :  { %1514 = vmatprep.subr.bf16.mxu0 %v1704_v0  ;;  %v1707_v2 = vld [vmem:[%s2283_s1 + $0x58] sm:$0xff]   ;;  %v1709_v4 = vld [vmem:[%s2283_s1 + $0x50] sm:$0xff]   ;;  %v1810_v5 = vld [vmem:[%s2284_s0] sm:$0xff]   ;;  %v1967_v35 = vshrl.u32 %v45_v32, 7  ;;  %vm1108_vm11 = vcmask 1042432  }
   0x3   :  { %1515 = vmatpush3.bf16.msra.mxu0 %v1704_v0  ;;  %1526 = vmatprep.subr.bf16.mxu1 %v1707_v2  ;;  %v1708_v6 = vld [vmem:[%s2283_s1] sm:$0xff]   ;;  %v1712_v7 = vld [vmem:[%s2283_s1 + $0x48] sm:$0xff]   ;;  %v1713_v9 = vld [vmem:[%s2283_s1 + $0x38] sm:$0xff]  }
   0x4   :  { %1516 = vmatprep.subr.bf16.mxu0 %v1705_v1  ;;  %1527 = vmatpush3.bf16.msra.mxu1 %v1707_v2  ;;  %v1714_v8 = vld [vmem:[%s2283_s1 + $0x40] sm:$0xff]   ;;  %v1831_v10 = vld [vmem:[%s2284_s0 + $0x8] sm:$0xff]   ;;  %v1715_v11 = vld [vmem:[%s2283_s1 + $0x30] sm:$0xff]   ;;  %v48_v38 = vadd.s32 16, %v1967_v35  ;;  %v54_v42 = vand.u32 15, %v1967_v35  ;;  %vm303_vm2 = vcmp.lt.s32.totalorder %v1967_v35, 1 }
   0x5   :  { %1528 = vmatprep.subr.bf16.mxu1 %v1709_v4  ;;  %1522 = vmatprep.mubr.msk.bf16.mxu0 %vm161_vm0, %v1810_v5  ;;  %v1716_v12 = vld [vmem:[%s2283_s1 + $0x28] sm:$0xff]   ;;  %v1717_v13 = vld [vmem:[%s2283_s1 + $0x20] sm:$0xff]   ;;  %v1854_v15 = vld [vmem:[%s2285_s4 + $0x78] sm:$0xff]  ;;  %v49_v44 = vadd.s32 24, %v1967_v35  ;;  %v47_v47 = vadd.s32 8, %v1967_v35  ;;  %vm316_vm5 = vcmp.lt.s32.totalorder %v1967_v35, 7 }
   0x6   :  { %1534 = vmatprep.mubr.msk.bf16.mxu1 %vm161_vm0, %v1810_v5  ;;  %v1862_v16 = vld [vmem:[%s2285_s4 + $0x70] sm:$0xff]  ;;  %v1869_v17 = vld [vmem:[%s2285_s4 + $0x68] sm:$0xff]  ;;  %v1876_v18 = vld [vmem:[%s2285_s4 + $0x60] sm:$0xff]  ;;  %v68_v43 = vand.u32 15, %v48_v38  ;;  %vm1974_vm3 = vcmp.ne.s32.totalorder %v54_v42, 0 }
   0x7   :  { %1517 = vmatpush3.bf16.msra.mxu0 %v1705_v1  ;;  %v1883_v19 = vld [vmem:[%s2285_s4 + $0x58] sm:$0xff]  ;;  %v1890_v20 = vld [vmem:[%s2285_s4 + $0x50] sm:$0xff]  ;;  %v1897_v21 = vld [vmem:[%s2285_s4 + $0x48] sm:$0xff]  ;;  %v75_v54 = vand.u32 15, %v49_v44  ;;  %v61_v58 = vand.u32 15, %v47_v47 }
   0x8   :  { %1518 = vmatprep.subr.bf16.mxu0 %v1706_v3  ;;  %1529 = vmatpush3.bf16.msra.mxu1 %v1709_v4  ;;  %v1904_v22 = vld [vmem:[%s2285_s4 + $0x40] sm:$0xff]  ;;  %v1911_v23 = vld [vmem:[%s2285_s4 + $0x38] sm:$0xff]  ;;  %v1917_v24 = vld [vmem:[%s2285_s4 + $0x30] sm:$0xff]  ;;  %vm1980_vm4 = vcmp.ne.s32.totalorder %v68_v43, 0 }
   0x9   :  { %1530 = vmatprep.subr.bf16.mxu1 %v1712_v7  ;;  %v1923_v25 = vld [vmem:[%s2285_s4 + $0x28] sm:$0xff]  ;;  %v1934_v26 = vld [vmem:[%s2285_s4 + $0x20] sm:$0xff]  ;;  %v1941_v27 = vld [vmem:[%s2285_s4 + $0x18] sm:$0xff]  ;;  %vm1991_vm6 = vcmp.ne.s32.totalorder %v75_v54, 15  ;;  %vm1995_vm7 = vcmp.ne.s32.totalorder %v61_v58, 15 }
   0xa   :  { %v1948_v28 = vld [vmem:[%s2285_s4 + $0x10] sm:$0xff]  ;;  %v1955_v29 = vld [vmem:[%s2285_s4 + $0x8] sm:$0xff]  ;;  %v1962_v30 = vld [vmem:[%s2285_s4] sm:$0xff] }
   0xb   :  { %1519 = vmatpush3.bf16.msra.mxu0 %v1706_v3 }
   0xc   :  { %1520 = vmatprep.subr.bf16.mxu0 %v1708_v6  ;;  %1531 = vmatpush3.bf16.msra.mxu1 %v1712_v7 }
   0xd   :  { %1532 = vmatprep.subr.bf16.mxu1 %v1714_v8 }
   0xf   :  { %1521 = vmatpush3.bf16.msra.mxu0 %v1708_v6 }
  0x10   :  { %1538 = vmatprep.subr.bf16.mxu0 %v1713_v9  ;;  %1533 = vmatpush3.bf16.msra.mxu1 %v1714_v8 }
  0x11   :  { %1550 = vmatprep.subr.mxu1 %v1750_v14 }
  0x12   :  { %1523 = vmatmul.mubr.msk.bf16.vlgmr.msra.gmra.mxu0 %vm161_vm0, %v1831_v10 }
  0x13   :  { %1539 = vmatpush3.bf16.msra.mxu0 %v1713_v9  ;;  %1546 = vmatprep.mubr.msk.bf16.mxu0 %vm161_vm0, %v1810_v5 }
  0x14   :  { %1540 = vmatprep.subr.bf16.mxu0 %v1715_v11  ;;  %1535 = vmatmul.mubr.msk.bf16.vlgmr.msra.gmra.mxu1 %vm161_vm0, %v1831_v10 }
  0x15   :  { %1551 = vmatpush3.msra.mxu1 %v1854_v15  ;;  %1582 = vmatprep.mubr.msk.f32.mxu1 %vm1751_vm1, %v1750_v14 }
  0x16   :  { %1552 = vmatprep.subr.mxu1 %v1750_v14 }
  0x17   :  { %1541 = vmatpush3.bf16.msra.mxu0 %v1715_v11  ;;  %1553 = vmatpush3.msra.mxu1 %v1862_v16 }
  0x18   :  { %1542 = vmatprep.subr.bf16.mxu0 %v1716_v12  ;;  %1554 = vmatprep.subr.mxu1 %v1750_v14 }
  0x19   :  { %1555 = vmatpush3.msra.mxu1 %v1869_v17 }
  0x1a   :  { %1556 = vmatprep.subr.mxu1 %v1750_v14 }
  0x1b   :  { %1543 = vmatpush3.bf16.msra.mxu0 %v1716_v12  ;;  %1557 = vmatpush3.msra.mxu1 %v1876_v18 }
  0x1c   :  { %1544 = vmatprep.subr.bf16.mxu0 %v1717_v13  ;;  %1558 = vmatprep.subr.mxu1 %v1750_v14 }
  0x1d   :  { %1559 = vmatpush3.msra.mxu1 %v1883_v19 }
  0x1e   :  { %1560 = vmatprep.subr.mxu1 %v1750_v14 }
  0x1f   :  { %1545 = vmatpush3.bf16.msra.mxu0 %v1717_v13  ;;  %1561 = vmatpush3.msra.mxu1 %v1890_v20 }
  0x20   :  { %1585 = vmatprep.subr.mxu0 %v1750_v14  ;;  %1562 = vmatprep.subr.mxu1 %v1750_v14 }
  0x21   :  { %1563 = vmatpush3.msra.mxu1 %v1897_v21 }
  0x22   :  { %1547 = vmatmul.mubr.msk.bf16.vlgmr.msra.gmra.mxu0 %vm161_vm0, %v1831_v10  ;;  %1564 = vmatprep.subr.mxu1 %v1750_v14 }
  0x23   :  { %1565 = vmatpush3.msra.mxu1 %v1904_v22  ;;  %1587 = vmatprep.mubr.msk.f32.mxu0 %vm1751_vm1, %v1750_v14 }
  0x24   :  { %1566 = vmatprep.subr.mxu1 %v1750_v14 }
  0x25   :  { %1567 = vmatpush3.msra.mxu1 %v1911_v23 }
  0x26   :  { %1568 = vmatprep.subr.mxu1 %v1750_v14 }
  0x27   :  { %1569 = vmatpush3.msra.mxu1 %v1917_v24 }
  0x28   :  { %1570 = vmatprep.subr.mxu1 %v1750_v14 }
  0x29   :  { %1571 = vmatpush3.msra.mxu1 %v1923_v25 }
  0x2a   :  { %1572 = vmatprep.subr.mxu1 %v1750_v14 }
  0x2b   :  { %1573 = vmatpush3.msra.mxu1 %v1934_v26 }
  0x2c   :  { %1574 = vmatprep.subr.mxu1 %v1750_v14 }
  0x2d   :  { %1575 = vmatpush3.msra.mxu1 %v1941_v27 }
  0x2e   :  { %1576 = vmatprep.subr.mxu1 %v1750_v14 }
  0x2f   :  { %1577 = vmatpush3.msra.mxu1 %v1948_v28 }
  0x30   :  { %1578 = vmatprep.subr.mxu1 %v1750_v14 }
  0x31   :  { %1579 = vmatpush3.msra.mxu1 %v1955_v29 }
  0x32   :  { %1580 = vmatprep.subr.mxu1 %v1750_v14 }
  0x33   :  { %1581 = vmatpush3.msra.mxu1 %v1962_v30 }
  0xd2   :  { %v1524_v31 = vpop.f32.mrf.mxu0 }
  0xd3   :  { %v301_v49 = vrot.slane %v1524_v31, 7 }
  0xd4   :  { %v202_v33 = vpop.f32.mrf.mxu0  ;;  %v1536_v34 = vpop.f32.mrf.mxu1 }
  0xd5   :  { %v299_v45 = vrot.slane %v202_v33, 7  ;;  %v314_v55 = vrot.slane %v1536_v34, 1 }
  0xd6   :  { %v1525_v36 = vpop.f32.mrf.mxu0  ;;  %v284_v37 = vpop.f32.mrf.mxu1 }
  0xd7   :  { %v302_v41 = vrot.slane %v1525_v36, 7  ;;  %v312_v59 = vrot.slane %v284_v37, 1 }
  0xd8   :  { %v205_v39 = vpop.f32.mrf.mxu0  ;;  %v1537_v40 = vpop.f32.mrf.mxu1 }
  0xd9   :  { %v300_v46 = vrot.slane %v205_v39, 7  ;;  %v307_v51 = vsel %vm303_vm2, %v302_v41, %v299_v45  ;;  %v315_v60 = vrot.slane %v1537_v40, 1  ;;  %v304_v9 = vsel %vm303_vm2, %v301_v49, %v302_v41 }
  0xda   :  { %v287_v48 = vpop.f32.mrf.mxu1  ;;  %v308_v61 = vsel %vm1974_vm3, %v307_v51, 0.0 }
  0xdb   :  { %v313_v56 = vrot.slane %v287_v48, 1  ;;  %v305_v57 = vsel %vm303_vm2, %v300_v46, %v301_v49  ;;  %v317_v7 = vsel %vm316_vm5, %v314_v55, %v315_v60  ;;  %v306_v11 = vsel %vm303_vm2, %v299_v45, %v300_v46 }
  0xdc   :  { %v310_v0 = vsel %vm1980_vm4, %v305_v57, 0.0  ;;  %v320_v31 = vsel %vm316_vm5, %v315_v60, %v312_v59 }
  0xdd   :  { %v318_v6 = vsel %vm316_vm5, %v313_v56, %v314_v55  ;;  %v319_v8 = vsel %vm316_vm5, %v312_v59, %v313_v56  ;;  %v324_v38 = vsel %vm1991_vm6, %v320_v31, 0.0 }
  0xde   :  { %v322_v34 = vsel %vm1995_vm7, %v318_v6, 0.0  ;;  %v1719_v6 = vld [vmem:[%s2287_s2 + $0xb8] sm:$0xff]  }
  0xdf   :  { %1610 = vmatprep.subr.bf16.mxu1 %v1719_v6 }
  0xe2   :  { %v1548_v53 = vpop.f32.mrf.mxu0 }
  0xe3   :  { %v392_v2 = vadd.f32 %v1548_v53, %v310_v0 }
  0xe4   :  { %v383_v62 = vpop.f32.mrf.mxu0 }
  0xe5   :  { %v384_v63 = vadd.f32 %v383_v62, %v308_v61  ;;  %v2015_v36 = vadd.f32 %v392_v2, %v317_v7  ;;  %v1718_v2 = vld [vmem:[%s2287_s2 + $0x38] sm:$0xff]   ;;  %v1721_v7 = vld [vmem:[%s2287_s2 + $0xb0] sm:$0xff]  }
  0xe6   :  { %v1549_v1 = vpop.f32.mrf.mxu0 }
  0xe7   :  { %v2009_v13 = vadd.f32 %v384_v63, %v319_v8  ;;  %v395_v32 = vadd.f32 %v1549_v1, %v304_v9  ;;  %v413_v43 = vmul.f32 %v2015_v36, %v2015_v36  ;;  %v2039_v1 = vld [vmem:[%s2286_s5] sm:$0xff]  ;;  %v1723_v8 = vld [vmem:[%s2287_s2 + $0xa8] sm:$0xff]  }
  0xe8   :  { %v386_v12 = vpop.f32.mrf.mxu0  ;;  %1586 = vmatpush3.msra.mxu0 %v2039_v1  ;;  %v1725_v9 = vld [vmem:[%s2287_s2 + $0xa0] sm:$0xff]  }
  0xe9   :  { %v387_v33 = vadd.f32 %v386_v12, %v306_v11  ;;  %v411_v39 = vmul.f32 %v2009_v13, %v2009_v13  ;;  %v2023_v40 = vadd.f32 %v395_v32, %v324_v38  ;;  %1590 = vmatprep.subr.bf16.mxu0 %v1718_v2  ;;  %v1727_v11 = vld [vmem:[%s2287_s2 + $0x98] sm:$0xff]  }
  0xeb   :  { %v2017_v37 = vadd.f32 %v387_v33, %v322_v34  ;;  %v414_v46 = vmul.f32 %v2023_v40, %v2023_v40 }
  0xed   :  { %v402_v41 = vadd.f32 %v2017_v37, %v2009_v13  ;;  %v412_v42 = vmul.f32 %v2017_v37, %v2017_v37 }
  0xef   :  { %v403_v44 = vadd.f32 %v402_v41, %v2015_v36  ;;  %v415_v45 = vadd.f32 %v412_v42, %v411_v39  ;;  %v2063_v42 = vld [vmem:[%s2288_s6] sm:$0xff] }
  0xf1   :  { %v404_v47 = vadd.f32 %v403_v44, %v2023_v40  ;;  %v416_v48 = vadd.f32 %v415_v45, %v413_v43 }
  0xf3   :  { %v405_v49 = vrot.slane %v404_v47, 4  ;;  %v417_v51 = vadd.f32 %v416_v48, %v414_v46  ;;  %v1720_v48 = vld [vmem:[%s2287_s2 + $0x30] sm:$0xff]  }
  0xf5   :  { %v406_v53 = vadd.f32 %v405_v49, %v404_v47  ;;  %v418_v54 = vrot.slane %v417_v51, 4 }
  0xf7   :  { %v407_v55 = vrot.slane %v406_v53, 2  ;;  %v419_v56 = vadd.f32 %v418_v54, %v417_v51  ;;  %v1722_v51 = vld [vmem:[%s2287_s2 + $0x28] sm:$0xff]   ;;  %v1726_v54 = vld [vmem:[%s2287_s2 + $0x18] sm:$0xff]  }
  0xf9   :  { %v408_v57 = vadd.f32 %v407_v55, %v406_v53  ;;  %v420_v58 = vrot.slane %v419_v56, 2  ;;  %v1724_v53 = vld [vmem:[%s2287_s2 + $0x20] sm:$0xff]   ;;  %v1728_v55 = vld [vmem:[%s2287_s2 + $0x10] sm:$0xff]  }
  0xfb   :  { %v409_v59 = vrot.slane %v408_v57, 1  ;;  %v421_v60 = vadd.f32 %v420_v58, %v419_v56  ;;  %v1729_v56 = vld [vmem:[%s2287_s2 + $0x90] sm:$0xff]   ;;  %v1731_v58 = vld [vmem:[%s2287_s2 + $0x88] sm:$0xff]  }
  0xfd   :  { %v422_v61 = vrot.slane %v421_v60, 1  ;;  %v410_v62 = vadd.f32 %v409_v59, %v408_v57  ;;  %v1730_v57 = vld [vmem:[%s2287_s2 + $0x8] sm:$0xff]   ;;  %v1732_v59 = vld [vmem:[%s2287_s2] sm:$0xff]  }
  0xff   :  { %v423_v63 = vadd.f32 %v422_v61, %v421_v60  ;;  %v1733_v60 = vld [vmem:[%s2287_s2 + $0x80] sm:$0xff]   ;;  %v1734_v61 = vld [vmem:[%s2287_s2 + $0x78] sm:$0xff]  }
 0x101   :  { %v425_v0 = vsel %vm424_vm8, %v410_v62, %v423_v63  ;;  %v1736_v62 = vld [vmem:[%s2289_s3 + $0x18] sm:$0xff]   ;;  %v591_v63 = vsub.s32 0, %v1967_v35 }
 0x102   :  { %1583 = vmatmul.mubr.f32.vlgmr.msra.gmra.mxu1 %v425_v0  ;;  %v599_v0 = vsub.s32 1, %v1967_v35 }
 0x103   :  { %1611 = vmatpush3.bf16.msra.mxu1 %v1719_v6 }
 0x104   :  { %1612 = vmatprep.subr.bf16.mxu1 %v1721_v7 }
 0x107   :  { %1613 = vmatpush3.bf16.msra.mxu1 %v1721_v7 }
 0x108   :  { %1614 = vmatprep.subr.bf16.mxu1 %v1723_v8 }
 0x10b   :  { %1615 = vmatpush3.bf16.msra.mxu1 %v1723_v8 }
 0x10c   :  { %1616 = vmatprep.subr.bf16.mxu1 %v1725_v9 }
 0x10f   :  { %1617 = vmatpush3.bf16.msra.mxu1 %v1725_v9 }
 0x110   :  { %1618 = vmatprep.subr.bf16.mxu1 %v1727_v11 }
 0x113   :  { %1619 = vmatpush3.bf16.msra.mxu1 %v1727_v11 }
 0x114   :  { %1620 = vmatprep.subr.bf16.mxu1 %v1729_v56 }
 0x117   :  { %1621 = vmatpush3.bf16.msra.mxu1 %v1729_v56 }
 0x118   :  { %1622 = vmatprep.subr.bf16.mxu1 %v1731_v58 }
 0x11b   :  { %1623 = vmatpush3.bf16.msra.mxu1 %v1731_v58 }
 0x11c   :  { %1624 = vmatprep.subr.bf16.mxu1 %v1733_v60 }
 0x11f   :  { %1625 = vmatpush3.bf16.msra.mxu1 %v1733_v60 }
 0x120   :  { %1650 = vmatprep.subr.bf16.mxu1 %v1736_v62 }
 0x1c2   :  { %v492_v12 = vpop.f32.mrf.mxu1 }
 0x1c3   :  { %v497_v31 = vmul.f32 0.001953125, %v492_v12 }
 0x1c4   :  { %v1584_v32 = vpop.f32.mrf.mxu1 }
 0x1c5   :  { %v498_v33 = vmul.f32 %v497_v31, %v497_v31 }
 0x1c7   :  { %v500_v34 = vrot.slane %v498_v33, 7 }
 0x1c9   :  { %v502_v38 = vsub.f32 %v497_v31, %v500_v34 }
 0x1cb   :  { %v503_v39 = vadd.f32 1e-05, %v502_v38 }
 0x1cd   :  { %1746 = vrsqrt.f32 %v503_v39 }
 0x1da   :  { %v1747_v41 = vpop.eup %1746 }
 0x1db   :  { %v506_v43 = vrot.slane %v1747_v41, 1 }
 0x1dd   :  { %v508_v44 = vmul.f32 %v506_v43, %v2063_v42 }
 0x1df   :  { %v509_v45 = vmul.f32 %v508_v44, %v497_v31 }
 0x1e1   :  { %v511_v46 = vrot.slane %v509_v45, 7 }
 0x1e3   :  { %v513_v47 = vsub.f32 %v2063_v42, %v511_v46 }
 0x1e5   :  { %v514_v49 = vsel %vm424_vm8, %v508_v44, %v513_v47  ;;  %v1739_v47 = vld [vmem:[%s2287_s2 + $0x60] sm:$0xff]  }
 0x1e6   :  { %1588 = vmatmul.mubr.msk.f32.vlgmr.msra.gmra.mxu0 %vm515_vm9, %v514_v49  ;;  %v1741_v49 = vld [vmem:[%s2287_s2 + $0x58] sm:$0xff]  }
 0x1e7   :  { %1591 = vmatpush3.bf16.msra.mxu0 %v1718_v2 }
 0x1e8   :  { %1592 = vmatprep.subr.bf16.mxu0 %v1720_v48 }
 0x1eb   :  { %1593 = vmatpush3.bf16.msra.mxu0 %v1720_v48  ;;  %v1742_v48 = vld [vmem:[%s2289_s3] sm:$0xff]  }
 0x1ec   :  { %1594 = vmatprep.subr.bf16.mxu0 %v1722_v51 }
 0x1ef   :  { %1595 = vmatpush3.bf16.msra.mxu0 %v1722_v51  ;;  %v1744_v51 = vld [vmem:[%s2287_s2 + $0x48] sm:$0xff]  }
 0x1f0   :  { %1596 = vmatprep.subr.bf16.mxu0 %v1724_v53 }
 0x1f3   :  { %1597 = vmatpush3.bf16.msra.mxu0 %v1724_v53 }
 0x1f4   :  { %1598 = vmatprep.subr.bf16.mxu0 %v1726_v54 }
 0x1f7   :  { %1599 = vmatpush3.bf16.msra.mxu0 %v1726_v54 }
 0x1f8   :  { %1600 = vmatprep.subr.bf16.mxu0 %v1728_v55 }
 0x1fb   :  { %1601 = vmatpush3.bf16.msra.mxu0 %v1728_v55 }
 0x1fc   :  { %1602 = vmatprep.subr.bf16.mxu0 %v1730_v57 }
 0x1ff   :  { %1603 = vmatpush3.bf16.msra.mxu0 %v1730_v57 }
 0x200   :  { %1604 = vmatprep.subr.bf16.mxu0 %v1732_v59 }
 0x203   :  { %1605 = vmatpush3.bf16.msra.mxu0 %v1732_v59 }
 0x204   :  { %1630 = vmatprep.subr.bf16.mxu0 %v1734_v61 }
 0x2a6   :  { %v585_v2 = vpop.f32.mrf.mxu0 }
 0x2a7   :  { %v592_v6 = vrot.slane %v585_v2, %v591_v63  ;;  %v600_v7 = vrot.slane %v585_v2, %v599_v0 }
 0x2a8   :  { %v1589_v8 = vpop.f32.mrf.mxu0 }
 0x2a9   :  { %v595_v9 = vmul.f32 %v592_v6, %v2015_v36  ;;  %v596_v11 = vmul.f32 %v592_v6, %v2023_v40  ;;  %v593_v12 = vmul.f32 %v592_v6, %v2009_v13  ;;  %v594_v31 = vmul.f32 %v592_v6, %v2017_v37  ;;  %v1735_v36 = vld [vmem:[%s2287_s2 + $0x70] sm:$0xff]   ;;  %v1737_v37 = vld [vmem:[%s2287_s2 + $0x68] sm:$0xff]  }
 0x2aa   :  { %v1738_v13 = vld [vmem:[%s2289_s3 + $0x10] sm:$0xff]   ;;  %v1740_v40 = vld [vmem:[%s2289_s3 + $0x8] sm:$0xff]  }
 0x2ab   :  { %v603_v32 = vadd.f32 %v600_v7, %v595_v9  ;;  %v604_v33 = vadd.f32 %v600_v7, %v596_v11  ;;  %v601_v34 = vadd.f32 %v600_v7, %v593_v12  ;;  %v602_v38 = vadd.f32 %v600_v7, %v594_v31 }
 0x2ad   :  { %v605_v39 = vmax.f32 %v601_v34, 0.0  ;;  %v606_v41 = vmax.f32 %v602_v38, 0.0  ;;  %v607_v43 = vmax.f32 %v603_v32, 0.0  ;;  %v608_v44 = vmax.f32 %v604_v33, 0.0 }
 0x2af   :  { %v609_v45 = vpack.c.bf16 %v606_v41, %v605_v39  ;;  %v610_v46 = vpack.c.bf16 %v608_v44, %v607_v43 }
 0x2b1   :  { %1606 = vmatprep.mubr.bf16.mxu0 %v609_v45  ;;  %1626 = vmatprep.mubr.bf16.mxu1 %v609_v45 }
 0x2b2   :  { %1607 = vmatmul.mubr.bf16.vlgmr.msra.gmra.mxu0 %v610_v46  ;;  %1627 = vmatmul.mubr.bf16.vlgmr.msra.gmra.mxu1 %v610_v46 }
 0x2b3   :  { %1631 = vmatpush3.bf16.msra.mxu0 %v1734_v61  ;;  %1646 = vmatprep.mubr.bf16.mxu0 %v609_v45 }
 0x2b4   :  { %1632 = vmatprep.subr.bf16.mxu0 %v1735_v36  ;;  %1651 = vmatpush3.bf16.msra.mxu1 %v1736_v62 }
 0x2b5   :  { %1652 = vmatprep.subr.bf16.mxu1 %v1738_v13  ;;  %1658 = vmatprep.mubr.msk.bf16.mxu1 %vm161_vm0, %v1810_v5  ;;  %v1743_v5 = vld [vmem:[%s2287_s2 + $0x50] sm:$0xff]  }
 0x2b7   :  { %1633 = vmatpush3.bf16.msra.mxu0 %v1735_v36 }
 0x2b8   :  { %1634 = vmatprep.subr.bf16.mxu0 %v1737_v37  ;;  %1653 = vmatpush3.bf16.msra.mxu1 %v1738_v13 }
 0x2b9   :  { %1654 = vmatprep.subr.bf16.mxu1 %v1740_v40 }
 0x2bb   :  { %1635 = vmatpush3.bf16.msra.mxu0 %v1737_v37 }
 0x2bc   :  { %1636 = vmatprep.subr.bf16.mxu0 %v1739_v47  ;;  %1655 = vmatpush3.bf16.msra.mxu1 %v1740_v40 }
 0x2bd   :  { %1656 = vmatprep.subr.bf16.mxu1 %v1742_v48 }
 0x2bf   :  { %1637 = vmatpush3.bf16.msra.mxu0 %v1739_v47 }
 0x2c0   :  { %1638 = vmatprep.subr.bf16.mxu0 %v1741_v49  ;;  %1657 = vmatpush3.bf16.msra.mxu1 %v1742_v48 }
 0x2c1   :  { %1662 = vmatprep.subr.mxu1 %v1750_v14 }
 0x2c3   :  { %1639 = vmatpush3.bf16.msra.mxu0 %v1741_v49  ;;  %1659 = vmatmul.mubr.msk.bf16.vlgmr.msra.gmra.mxu1 %vm161_vm0, %v1831_v10  ;;  %v1745_v10 = vld [vmem:[%s2287_s2 + $0x40] sm:$0xff]  }
 0x2c4   :  { %1640 = vmatprep.subr.bf16.mxu0 %v1743_v5  ;;  %1663 = vmatpush3.msra.mxu1 %v1854_v15 }
 0x2c5   :  { %1664 = vmatprep.subr.mxu1 %v1750_v14  ;;  %1694 = vmatprep.mubr.msk.f32.mxu1 %vm1751_vm1, %v1750_v14 }
 0x2c6   :  { %1665 = vmatpush3.msra.mxu1 %v1862_v16 }
 0x2c7   :  { %1641 = vmatpush3.bf16.msra.mxu0 %v1743_v5  ;;  %1666 = vmatprep.subr.mxu1 %v1750_v14 }
 0x2c8   :  { %1642 = vmatprep.subr.bf16.mxu0 %v1744_v51  ;;  %1667 = vmatpush3.msra.mxu1 %v1869_v17 }
 0x2c9   :  { %1668 = vmatprep.subr.mxu1 %v1750_v14 }
 0x2ca   :  { %1669 = vmatpush3.msra.mxu1 %v1876_v18 }
 0x2cb   :  { %1643 = vmatpush3.bf16.msra.mxu0 %v1744_v51  ;;  %1670 = vmatprep.subr.mxu1 %v1750_v14 }
 0x2cc   :  { %1644 = vmatprep.subr.bf16.mxu0 %v1745_v10  ;;  %1671 = vmatpush3.msra.mxu1 %v1883_v19 }
 0x2cd   :  { %1672 = vmatprep.subr.mxu1 %v1750_v14 }
 0x2ce   :  { %1673 = vmatpush3.msra.mxu1 %v1890_v20 }
 0x2cf   :  { %1645 = vmatpush3.bf16.msra.mxu0 %v1745_v10  ;;  %1674 = vmatprep.subr.mxu1 %v1750_v14 }
 0x2d0   :  { %1675 = vmatpush3.msra.mxu1 %v1897_v21  ;;  %1697 = vmatprep.subr.mxu0 %v1750_v14 }
 0x2d1   :  { %1676 = vmatprep.subr.mxu1 %v1750_v14 }
 0x2d2   :  { %1647 = vmatmul.mubr.bf16.vlgmr.msra.gmra.mxu0 %v610_v46  ;;  %1677 = vmatpush3.msra.mxu1 %v1904_v22 }
 0x2d3   :  { %1678 = vmatprep.subr.mxu1 %v1750_v14  ;;  %1698 = vmatpush3.msra.mxu0 %v2039_v1 }
 0x2d4   :  { %1679 = vmatpush3.msra.mxu1 %v1911_v23  ;;  %1699 = vmatprep.mubr.msk.f32.mxu0 %vm1751_vm1, %v1750_v14 }
 0x2d5   :  { %1680 = vmatprep.subr.mxu1 %v1750_v14 }
 0x2d6   :  { %1681 = vmatpush3.msra.mxu1 %v1917_v24 }
 0x2d7   :  { %1682 = vmatprep.subr.mxu1 %v1750_v14 }
 0x2d8   :  { %1683 = vmatpush3.msra.mxu1 %v1923_v25 }
 0x2d9   :  { %1684 = vmatprep.subr.mxu1 %v1750_v14 }
 0x2da   :  { %1685 = vmatpush3.msra.mxu1 %v1934_v26 }
 0x2db   :  { %1686 = vmatprep.subr.mxu1 %v1750_v14 }
 0x2dc   :  { %1687 = vmatpush3.msra.mxu1 %v1941_v27 }
 0x2dd   :  { %1688 = vmatprep.subr.mxu1 %v1750_v14 }
 0x2de   :  { %1689 = vmatpush3.msra.mxu1 %v1948_v28 }
 0x2df   :  { %1690 = vmatprep.subr.mxu1 %v1750_v14 }
 0x2e0   :  { %1691 = vmatpush3.msra.mxu1 %v1955_v29 }
 0x2e1   :  { %1692 = vmatprep.subr.mxu1 %v1750_v14 }
 0x2e2   :  { %1693 = vmatpush3.msra.mxu1 %v1962_v30 }
 0x372   :  { %v1628_v15 = vpop.f32.mrf.mxu1  ;;  %v1608_v18 = vpop.f32.mrf.mxu0 }
 0x373   :  { %v857_v56 = vrot.slane %v1608_v18, 7  ;;  %v869_v8 = vrot.slane %v1628_v15, 1 }
 0x374   :  { %v840_v16 = vpop.f32.mrf.mxu1  ;;  %v726_v21 = vpop.f32.mrf.mxu0 }
 0x375   :  { %v855_v30 = vrot.slane %v726_v21, 7  ;;  %v867_v12 = vrot.slane %v840_v16, 1 }
 0x376   :  { %v1629_v17 = vpop.f32.mrf.mxu1  ;;  %v1609_v24 = vpop.f32.mrf.mxu0 }
 0x377   :  { %v858_v29 = vrot.slane %v1609_v24, 7  ;;  %v870_v9 = vrot.slane %v1629_v17, 1 }
 0x378   :  { %v843_v19 = vpop.f32.mrf.mxu1  ;;  %v729_v26 = vpop.f32.mrf.mxu0 }
 0x379   :  { %v856_v1 = vrot.slane %v729_v26, 7  ;;  %v862_v57 = vsel %vm303_vm2, %v858_v29, %v855_v30  ;;  %v868_v59 = vrot.slane %v843_v19, 1  ;;  %v859_v34 = vsel %vm303_vm2, %v857_v56, %v858_v29 }
 0x37a   :  { %v863_v6 = vsel %vm1974_vm3, %v862_v57, 0.0  ;;  %v874_v52 = vsel %vm316_vm5, %v870_v9, %v867_v12  ;;  %v871_v13 = vsel %vm316_vm5, %v869_v8, %v870_v9 }
 0x37b   :  { %v860_v60 = vsel %vm303_vm2, %v856_v1, %v857_v56  ;;  %v872_v38 = vsel %vm316_vm5, %v868_v59, %v869_v8  ;;  %v873_v50 = vsel %vm316_vm5, %v867_v12, %v868_v59  ;;  %v861_v43 = vsel %vm303_vm2, %v855_v30, %v856_v1 }
 0x37c   :  { %v865_v31 = vsel %vm1980_vm4, %v860_v60, 0.0  ;;  %v876_v37 = vsel %vm1995_vm7, %v872_v38, 0.0  ;;  %v878_v5 = vsel %vm1991_vm6, %v874_v52, 0.0 }
 0x383   :  { %v2187_v20 = vpop.f32.mrf.mxu1 }
 0x384   :  { %v1094_v53 = vmul.f32 %v2187_v20, %v2187_v20 }
 0x385   :  { %v2189_v22 = vpop.f32.mrf.mxu1 }
 0x386   :  { %v1092_v14 = vmul.f32 %v2189_v22, %v2189_v22 }
 0x387   :  { %v2191_v23 = vpop.f32.mrf.mxu1 }
 0x388   :  { %v1095_v61 = vmul.f32 %v2191_v23, %v2191_v23 }
 0x389   :  { %v2193_v25 = vpop.f32.mrf.mxu1 }
 0x38a   :  { %v1070_v27 = vadd.f32 %v2193_v25, %v2189_v22  ;;  %v1093_v28 = vmul.f32 %v2193_v25, %v2193_v25 }
 0x38c   :  { %v1071_v54 = vadd.f32 %v2187_v20, %v1070_v27  ;;  %v1096_v55 = vadd.f32 %v1093_v28, %v1092_v14 }
 0x38e   :  { %v1072_v62 = vadd.f32 %v2191_v23, %v1071_v54  ;;  %v1097_v2 = vadd.f32 %v1096_v55, %v1094_v53 }
 0x390   :  { %v1073_v39 = vrot.slane %v1072_v62, 4  ;;  %v1098_v41 = vadd.f32 %v1097_v2, %v1095_v61 }
 0x392   :  { %v1648_v58 = vpop.f32.mrf.mxu0  ;;  %v1074_v48 = vadd.f32 %v1073_v39, %v1072_v62  ;;  %v1099_v49 = vrot.slane %v1098_v41, 4 }
 0x393   :  { %v970_v33 = vadd.f32 %v1648_v58, %v865_v31 }
 0x394   :  { %v961_v7 = vpop.f32.mrf.mxu0  ;;  %v1100_v19 = vadd.f32 %v1099_v49, %v1098_v41  ;;  %v1075_v3 = vrot.slane %v1074_v48, 2 }
 0x395   :  { %v962_v11 = vadd.f32 %v961_v7, %v863_v6  ;;  %v2231_v40 = vadd.f32 %v970_v33, %v871_v13 }
 0x396   :  { %v1649_v32 = vpop.f32.mrf.mxu0  ;;  %v1101_v28 = vrot.slane %v1100_v19, 2  ;;  %v1076_v29 = vadd.f32 %v1075_v3, %v1074_v48  ;;  %v1284_v48 = vsub.s32 2, %v1967_v35 }
 0x397   :  { %v2223_v45 = vadd.f32 %v962_v11, %v873_v50  ;;  %v973_v46 = vadd.f32 %v1649_v32, %v859_v34  ;;  %v1081_v16 = vmul.f32 %v2231_v40, %v2231_v40 }
 0x398   :  { %v964_v44 = vpop.f32.mrf.mxu0  ;;  %v1102_v55 = vadd.f32 %v1101_v28, %v1100_v19  ;;  %v1077_v56 = vrot.slane %v1076_v29, 1 }
 0x399   :  { %v965_v36 = vadd.f32 %v964_v44, %v861_v43  ;;  %v1079_v51 = vmul.f32 %v2223_v45, %v2223_v45  ;;  %v2239_v10 = vadd.f32 %v973_v46, %v878_v5 }
 0x39a   :  { %v1103_v61 = vrot.slane %v1102_v55, 1  ;;  %v1078_v2 = vadd.f32 %v1077_v56, %v1076_v29 }
 0x39b   :  { %v2233_v47 = vadd.f32 %v965_v36, %v876_v37  ;;  %v1082_v21 = vmul.f32 %v2239_v10, %v2239_v10 }
 0x39c   :  { %v1104_v9 = vadd.f32 %v1103_v61, %v1102_v55 }
 0x39d   :  { %v1061_v15 = vadd.f32 %v2233_v47, %v2223_v45  ;;  %v1080_v4 = vmul.f32 %v2233_v47, %v2233_v47 }
 0x39f   :  { %v1062_v17 = vadd.f32 %v1061_v15, %v2231_v40  ;;  %v1083_v18 = vadd.f32 %v1080_v4, %v1079_v51  ;;  %v1304_v4 = vsub.s32 3, %v1967_v35 }
 0x3a1   :  { %v1063_v24 = vadd.f32 %v1062_v17, %v2239_v10  ;;  %v1084_v26 = vadd.f32 %v1083_v18, %v1081_v16 }
 0x3a3   :  { %v1064_v14 = vrot.slane %v1063_v24, 4  ;;  %v1085_v27 = vadd.f32 %v1084_v26, %v1082_v21 }
 0x3a5   :  { %v1065_v30 = vadd.f32 %v1064_v14, %v1063_v24  ;;  %v1086_v1 = vrot.slane %v1085_v27, 4 }
 0x3a7   :  { %v1066_v53 = vrot.slane %v1065_v30, 2  ;;  %v1087_v54 = vadd.f32 %v1086_v1, %v1085_v27 }
 0x3a9   :  { %v1067_v57 = vadd.f32 %v1066_v53, %v1065_v30  ;;  %v1088_v58 = vrot.slane %v1087_v54, 2 }
 0x3ab   :  { %v1068_v59 = vrot.slane %v1067_v57, 1  ;;  %v1089_v60 = vadd.f32 %v1088_v58, %v1087_v54 }
 0x3ad   :  { %v1069_v62 = vadd.f32 %v1068_v59, %v1067_v57  ;;  %v1090_v6 = vrot.slane %v1089_v60, 1 }
 0x3af   :  { %v1091_v7 = vadd.f32 %v1090_v6, %v1089_v60  ;;  %v1105_v8 = vsel %vm424_vm8, %v1069_v62, %v1078_v2 }
 0x3b1   :  { %v1107_v11 = vsel %vm1106_vm10, %v1105_v8, %v1091_v7 }
 0x3b2   :  { %v1109_v12 = vsel %vm1108_vm11, %v1107_v11, %v1104_v9 }
 0x3b3   :  { %1695 = vmatmul.mubr.f32.vlgmr.msra.gmra.mxu1 %v1109_v12 }
 0x473   :  { %v1176_v31 = vpop.f32.mrf.mxu1 }
 0x474   :  { %v1180_v32 = vmul.f32 0.001953125, %v1176_v31 }
 0x475   :  { %v1696_v33 = vpop.f32.mrf.mxu1 }
 0x476   :  { %v1181_v34 = vmul.f32 %v1180_v32, %v1180_v32 }
 0x478   :  { %v1183_v38 = vrot.slane %v1181_v34, 6 }
 0x47a   :  { %v1185_v39 = vsub.f32 %v1180_v32, %v1183_v38 }
 0x47c   :  { %v1186_v41 = vadd.f32 1e-05, %v1185_v39 }
 0x47e   :  { %1748 = vrsqrt.f32 %v1186_v41 }
 0x48b   :  { %v1749_v50 = vpop.eup %1748 }
 0x48c   :  { %v1188_v43 = vmul.f32 %v1749_v50, %v2063_v42 }
 0x48e   :  { %v1190_v44 = vrot.slane %v1188_v43, 2 }
 0x490   :  { %v1192_v52 = vmul.f32 %v1190_v44, %v1180_v32 }
 0x492   :  { %v1194_v46 = vrot.slane %v1192_v52, 4 }
 0x494   :  { %v1196_v36 = vsub.f32 %v2063_v42, %v1194_v46 }
 0x496   :  { %v1198_v13 = vrot.slane %v1196_v36, 2 }
 0x498   :  { %v1200_v37 = vsel %vm1106_vm10, %v1190_v44, %v1198_v13 }
 0x499   :  { %1700 = vmatmul.mubr.msk.f32.vlgmr.msra.gmra.mxu0 %vm515_vm9, %v1200_v37 }
 0x559   :  { %v1270_v49 = vpop.f32.mrf.mxu0 }
 0x55a   :  { %v1277_v5 = vrot.slane %v1270_v49, %v591_v63  ;;  %v1293_v51 = vrot.slane %v1270_v49, %v599_v0  ;;  %v1285_v15 = vrot.slane %v1270_v49, %v1284_v48  ;;  %v1305_v27 = vrot.slane %v1270_v49, %v1304_v4 }
 0x55b   :  { %v1701_v16 = vpop.f32.mrf.mxu0 }
 0x55c   :  { %v1278_v42 = vmul.f32 %v1277_v5, %v2223_v45  ;;  %v1279_v17 = vmul.f32 %v1277_v5, %v2233_v47  ;;  %v1280_v18 = vmul.f32 %v1277_v5, %v2231_v40  ;;  %v1281_v19 = vmul.f32 %v1277_v5, %v2239_v10 }
 0x55d   :  { %v1294_v3 = vmul.f32 %v1293_v51, %v2189_v22  ;;  %v1295_v21 = vmul.f32 %v1293_v51, %v2193_v25  ;;  %v1296_v63 = vmul.f32 %v2187_v20, %v1293_v51  ;;  %v1297_v0 = vmul.f32 %v2191_v23, %v1293_v51 }
 0x55e   :  { %v1286_v24 = vadd.f32 %v1285_v15, %v1278_v42  ;;  %v1287_v26 = vadd.f32 %v1285_v15, %v1279_v17  ;;  %v1288_v35 = vadd.f32 %v1285_v15, %v1280_v18  ;;  %v1289_v14 = vadd.f32 %v1285_v15, %v1281_v19 }
 0x560   :  { %v1298_v45 = vadd.f32 %v1294_v3, %v1286_v24  ;;  %v1299_v28 = vadd.f32 %v1295_v21, %v1287_v26  ;;  %v1300_v47 = vadd.f32 %v1296_v63, %v1288_v35  ;;  %v1301_v29 = vadd.f32 %v1297_v0, %v1289_v14 }
 0x562   :  { %v1306_v40 = vadd.f32 %v1305_v27, %v1298_v45  ;;  %v1307_v30 = vadd.f32 %v1305_v27, %v1299_v28  ;;  %v1308_v10 = vadd.f32 %v1305_v27, %v1300_v47  ;;  %v1309_v1 = vadd.f32 %v1305_v27, %v1301_v29 }
 0x564   :  { %v1310_v22 = vmax.f32 %v1306_v40, 0.0  ;;  %v1311_v53 = vmax.f32 %v1307_v30, 0.0  ;;  %v1312_v25 = vmax.f32 %v1308_v10, 0.0  ;;  %v1313_v54 = vmax.f32 %v1309_v1, 0.0 }
 0x566   :  { %1314 = vst [vmem:[%s2290_s7] sm:$0xff] %v1310_v22  ;;  %1315 = vst [vmem:[%s2290_s7 + $0x8] sm:$0xff] %v1311_v53 }
 0x567   :  { %1316 = vst [vmem:[%s2290_s7 + $0x10] sm:$0xff] %v1312_v25  ;;  %1317 = vst [vmem:[%s2290_s7 + $0x18] sm:$0xff] %v1313_v54 }

</bundles_post_ra>
